<compile_context>
chip_gen: v7x
topology: tpu7x:2x2x1
jax: 0.10.0
libtpu: 0.0.40
codegen_flags: <defaults>
</compile_context>

<pallas_src>
import functools

import jax
import jax.numpy as jnp
from jax.experimental import pallas as pl
from jax.experimental.pallas import tpu as pltpu


INPUT_SIZE = 1 + 2 + 1 + 1 + 1   # health(1) + position(2) + stage(1) + room_clear(1) + enemy_count(1) = 6
H1, H2, H3 = 128, 256, 128
ACTION_SIZE = 9                  # synthetic action_space.n
OUT_PAD = 128                    # lane-dense output width (>= ACTION_SIZE, multiple of 128)
DEFAULT_BLOCK_B = 1024           # batch tile cap (amortizes ~0.35us/step grid overhead)
SINGLE_STEP_MAX = 256            # batches up to this many rows run as one grid step


def _round_up(n, m):
    return ((n + m - 1) // m) * m


def _choose_tile(B, block_b):
    """Pick the batch tile (static Python on static shapes)."""
    tb_full = _round_up(max(B, 1), 16)        # bf16 sublanes pack in 16s
    if tb_full <= SINGLE_STEP_MAX:
        return tb_full                        # tiny/latency path: one grid step
    # Large batch: cap the tile but keep >= 2 grid steps so the "parallel"
    # batch axis can be sharded across v7x's two TensorCores.
    half = _round_up((tb_full + 1) // 2, 16)
    return max(16, min(block_b, half))


def _dqn_kernel(x_ref,
                w1_ref, b1_ref,
                w2_ref, b2_ref,
                w3_ref, b3_ref,
                w4_ref, b4_ref,
                o_ref):
    # bf16 operands into the MXU, f32 accumulation; bias/ReLU in f32 (VPU).
    h = jnp.dot(x_ref[...], w1_ref[...], preferred_element_type=jnp.float32)   # (TB, 128)
    h = jnp.maximum(h + b1_ref[...], 0.0)
    h = jnp.dot(h.astype(jnp.bfloat16), w2_ref[...],
                preferred_element_type=jnp.float32)                            # (TB, 256)
    h = jnp.maximum(h + b2_ref[...], 0.0)
    h = jnp.dot(h.astype(jnp.bfloat16), w3_ref[...],
                preferred_element_type=jnp.float32)                            # (TB, 128)
    h = jnp.maximum(h + b3_ref[...], 0.0)
    q = jnp.dot(h.astype(jnp.bfloat16), w4_ref[...],
                preferred_element_type=jnp.float32)                            # (TB, 128) lane-dense
    o_ref[...] = (q + b4_ref[...]).astype(o_ref.dtype)                         # bf16 store (halved DMA)


def prepare_params(params):
    """One-time kernel-side formatting of the raw f32 params (hoisted out of the hot path)."""
    return {
        "w1": params["w1"].astype(jnp.bfloat16),
        "w2": params["w2"].astype(jnp.bfloat16),
        "w3": params["w3"].astype(jnp.bfloat16),
        # Pad the last layer to a lane-dense 128-wide output (unmasked stores).
        "w4": jnp.pad(params["w4"], ((0, 0), (0, OUT_PAD - ACTION_SIZE))).astype(jnp.bfloat16),
        "b1": params["b1"].astype(jnp.float32),
        "b2": params["b2"].astype(jnp.float32),
        "b3": params["b3"].astype(jnp.float32),
        "b4": jnp.pad(params["b4"], ((0, 0), (0, OUT_PAD - ACTION_SIZE))).astype(jnp.float32),
    }


@functools.partial(jax.jit, static_argnames=("block_b",))
def dqn_forward(x, prepped, block_b=DEFAULT_BLOCK_B):
    """x: (B, INPUT_SIZE) f32.  prepped: output of prepare_params()."""
    B = x.shape[0]
    tb = _choose_tile(B, block_b)
    Bp = _round_up(B, tb)

    xp = x if Bp == B else jnp.pad(x, ((0, Bp - B), (0, 0)))
    xp = xp.astype(jnp.bfloat16)

    w1, w2, w3, w4 = prepped["w1"], prepped["w2"], prepped["w3"], prepped["w4"]
    b1, b2, b3, b4 = prepped["b1"], prepped["b2"], prepped["b3"], prepped["b4"]

    grid = (Bp // tb,)
    const = lambda i: (0, 0)   # weights/biases: same block every step -> VMEM-resident
    in_specs = [
        pl.BlockSpec((tb, INPUT_SIZE), lambda i: (i, 0)),
        pl.BlockSpec((INPUT_SIZE, H1), const), pl.BlockSpec((1, H1), const),
        pl.BlockSpec((H1, H2), const),         pl.BlockSpec((1, H2), const),
        pl.BlockSpec((H2, H3), const),         pl.BlockSpec((1, H3), const),
        pl.BlockSpec((H3, OUT_PAD), const),    pl.BlockSpec((1, OUT_PAD), const),
    ]
    out_specs = pl.BlockSpec((tb, OUT_PAD), lambda i: (i, 0))

    flops = 2 * Bp * (INPUT_SIZE * H1 + H1 * H2 + H2 * H3 + H3 * OUT_PAD)
    bytes_accessed = (xp.size * 2                                   # bf16 input
                      + (w1.size + w2.size + w3.size + w4.size) * 2 # bf16 weights
                      + (b1.size + b2.size + b3.size + b4.size) * 4 # f32 biases
                      + Bp * OUT_PAD * 2)                           # bf16 output

    q_pad = pl.pallas_call(
        _dqn_kernel,
        out_shape=jax.ShapeDtypeStruct((Bp, OUT_PAD), jnp.bfloat16),
        grid_spec=pltpu.PrefetchScalarGridSpec(
            num_scalar_prefetch=0,
            grid=grid,
            in_specs=in_specs,
            out_specs=out_specs),
        compiler_params=pltpu.CompilerParams(
            dimension_semantics=("parallel",),          # 2 TCs on v7x; no-op on v5e/v6e
            vmem_limit_bytes=16 * 1024 * 1024),
        cost_estimate=pl.CostEstimate(
            flops=flops, transcendentals=0, bytes_accessed=int(bytes_accessed)),
    )(xp, w1, b1, w2, b2, w3, b3, w4, b4)

    # Slice off batch/lane padding; return f32 Q-values to match the torch module.
    return q_pad[:B, :ACTION_SIZE].astype(jnp.float32)


def init_params(key):
    """Deterministic init mimicking torch.nn.Linear default (uniform +-1/sqrt(fan_in))."""
    dims = [(INPUT_SIZE, H1), (H1, H2), (H2, H3), (H3, ACTION_SIZE)]
    params = {}
    keys = jax.random.split(key, 2 * len(dims))
    for i, (fin, fout) in enumerate(dims):
        bound = 1.0 / jnp.sqrt(jnp.float32(fin))
        params[f"w{i+1}"] = jax.random.uniform(
            keys[2 * i], (fin, fout), jnp.float32, -bound, bound)
        params[f"b{i+1}"] = jax.random.uniform(
            keys[2 * i + 1], (1, fout), jnp.float32, -bound, bound)
    return params


def dqn_apply(state_dict, prepped_params):
    # Matches torch.cat([health, position, stage, room_clear, enemy_count], dim=1)
    x = jnp.concatenate([state_dict["health"],
                         state_dict["position"],
                         state_dict["stage"],
                         state_dict["room_clear"],
                         state_dict["enemy_count"]], axis=1).astype(jnp.float32)
    return dqn_forward(x, prepped_params)


def _ref_forward(x, params):
    """Pure-JAX reference mimicking the kernel's bf16-operand / f32-accumulate math."""
    bf = lambda a: a.astype(jnp.bfloat16).astype(jnp.float32)
    hp = jax.lax.Precision.HIGHEST
    h = jnp.maximum(jnp.dot(bf(x), bf(params["w1"]), precision=hp) + params["b1"], 0.0)
    h = jnp.maximum(jnp.dot(bf(h), bf(params["w2"]), precision=hp) + params["b2"], 0.0)
    h = jnp.maximum(jnp.dot(bf(h), bf(params["w3"]), precision=hp) + params["b3"], 0.0)
    return jnp.dot(bf(h), bf(params["w4"]), precision=hp) + params["b4"]


if __name__ == "__main__":
    key = jax.random.PRNGKey(0)
    kp, kh, kpos, ks, kr, ke = jax.random.split(key, 6)
    B = 2
    params = init_params(kp)
    prepped = prepare_params(params)          # hoisted: done once, reused every forward

    state_dict = {
        "health":      jax.random.uniform(kh,   (B, 1), jnp.float32),
        "position":    jax.random.uniform(kpos, (B, 2), jnp.float32),
        "stage":       jax.random.uniform(ks,   (B, 1), jnp.float32),
        "room_clear":  jax.random.uniform(kr,   (B, 1), jnp.float32),
        "enemy_count": jax.random.uniform(ke,   (B, 1), jnp.float32),
    }

    q = dqn_apply(state_dict, prepped)
    q = jax.block_until_ready(q)

    x = jnp.concatenate([state_dict["health"], state_dict["position"],
                         state_dict["stage"], state_dict["room_clear"],
                         state_dict["enemy_count"]], axis=1)
    ref = _ref_forward(x, params)

    assert q.shape == (B, ACTION_SIZE)
    assert jnp.allclose(q, ref, atol=2e-2, rtol=2e-2), (q, ref)

    # Also exercise a batch large enough to span several grid steps (>=2 on v7x).
    kb = jax.random.PRNGKey(1)
    xb = jax.random.uniform(kb, (1000, INPUT_SIZE), jnp.float32)
    qb = jax.block_until_ready(dqn_forward(xb, prepped))
    refb = _ref_forward(xb, params)
    assert qb.shape == (1000, ACTION_SIZE)
    assert jnp.allclose(qb, refb, atol=2e-2, rtol=2e-2)

    print("KERNEL_OK")
</pallas_src>

<mosaic_0001>
module attributes {stable_mosaic.version = 11 : i64} {
  func.func @_dqn_kernel(%arg0: i32, %arg1: memref<16x6xbf16, #tpu.memory_space<vmem>>, %arg2: memref<6x128xbf16, #tpu.memory_space<vmem>>, %arg3: memref<1x128xf32, #tpu.memory_space<vmem>>, %arg4: memref<128x256xbf16, #tpu.memory_space<vmem>>, %arg5: memref<1x256xf32, #tpu.memory_space<vmem>>, %arg6: memref<256x128xbf16, #tpu.memory_space<vmem>>, %arg7: memref<1x128xf32, #tpu.memory_space<vmem>>, %arg8: memref<128x128xbf16, #tpu.memory_space<vmem>>, %arg9: memref<1x128xf32, #tpu.memory_space<vmem>>, %arg10: memref<16x128xbf16, #tpu.memory_space<vmem>>) attributes {dimension_semantics = [#tpu.dimension_semantics<parallel>], iteration_bounds = array<i64: 1>, scalar_prefetch = 0 : i64, scratch_operands = 0 : i64, tpu.core_type = #tpu.core_type<tc>, window_params = [{transform_indices = @transform_0, window_bounds = array<i64: 16, 6>}, {pipeline_mode = #tpu.pipeline_mode<synchronous>, transform_indices = @transform_1, window_bounds = array<i64: 6, 128>}, {pipeline_mode = #tpu.pipeline_mode<synchronous>, transform_indices = @transform_2, window_bounds = array<i64: 1, 128>}, {pipeline_mode = #tpu.pipeline_mode<synchronous>, transform_indices = @transform_3, window_bounds = array<i64: 128, 256>}, {pipeline_mode = #tpu.pipeline_mode<synchronous>, transform_indices = @transform_4, window_bounds = array<i64: 1, 256>}, {pipeline_mode = #tpu.pipeline_mode<synchronous>, transform_indices = @transform_5, window_bounds = array<i64: 256, 128>}, {pipeline_mode = #tpu.pipeline_mode<synchronous>, transform_indices = @transform_6, window_bounds = array<i64: 1, 128>}, {pipeline_mode = #tpu.pipeline_mode<synchronous>, transform_indices = @transform_7, window_bounds = array<i64: 128, 128>}, {pipeline_mode = #tpu.pipeline_mode<synchronous>, transform_indices = @transform_8, window_bounds = array<i64: 1, 128>}, {transform_indices = @transform_9, window_bounds = array<i64: 16, 128>}]} {
    %c0 = arith.constant 0 : index
    %c0_0 = arith.constant 0 : index
    %0 = vector.load %arg1[%c0, %c0_0] : memref<16x6xbf16, #tpu.memory_space<vmem>>, vector<16x6xbf16>
    %c0_1 = arith.constant 0 : index
    %c0_2 = arith.constant 0 : index
    %1 = vector.load %arg2[%c0_1, %c0_2] : memref<6x128xbf16, #tpu.memory_space<vmem>>, vector<6x128xbf16>
    %cst = arith.constant dense<0.000000e+00> : vector<16x128xf32>
    %2 = tpu.matmul %0, %1, %cst {dimension_numbers = #tpu.dot_dimension_numbers<[1], [0], [0], [1], [0, 0, 1, 1], [], []>} : vector<16x6xbf16>, vector<6x128xbf16>, vector<16x128xf32> -> vector<16x128xf32>
    %c0_3 = arith.constant 0 : index
    %c0_4 = arith.constant 0 : index
    %3 = vector.load %arg3[%c0_3, %c0_4] : memref<1x128xf32, #tpu.memory_space<vmem>>, vector<1x128xf32>
    %4 = vector.broadcast %3 : vector<1x128xf32> to vector<16x128xf32>
    %5 = arith.addf %2, %4 : vector<16x128xf32>
    %cst_5 = arith.constant 0.000000e+00 : f32
    %6 = vector.broadcast %cst_5 : f32 to vector<16x128xf32>
    %7 = arith.maximumf %5, %6 : vector<16x128xf32>
    %8 = arith.truncf %7 : vector<16x128xf32> to vector<16x128xbf16>
    %c0_6 = arith.constant 0 : index
    %c0_7 = arith.constant 0 : index
    %9 = vector.load %arg4[%c0_6, %c0_7] : memref<128x256xbf16, #tpu.memory_space<vmem>>, vector<128x256xbf16>
    %cst_8 = arith.constant dense<0.000000e+00> : vector<16x256xf32>
    %10 = tpu.matmul %8, %9, %cst_8 {dimension_numbers = #tpu.dot_dimension_numbers<[1], [0], [0], [1], [0, 0, 1, 1], [], []>} : vector<16x128xbf16>, vector<128x256xbf16>, vector<16x256xf32> -> vector<16x256xf32>
    %c0_9 = arith.constant 0 : index
    %c0_10 = arith.constant 0 : index
    %11 = vector.load %arg5[%c0_9, %c0_10] : memref<1x256xf32, #tpu.memory_space<vmem>>, vector<1x256xf32>
    %12 = vector.broadcast %11 : vector<1x256xf32> to vector<16x256xf32>
    %13 = arith.addf %10, %12 : vector<16x256xf32>
    %cst_11 = arith.constant 0.000000e+00 : f32
    %14 = vector.broadcast %cst_11 : f32 to vector<16x256xf32>
    %15 = arith.maximumf %13, %14 : vector<16x256xf32>
    %16 = arith.truncf %15 : vector<16x256xf32> to vector<16x256xbf16>
    %c0_12 = arith.constant 0 : index
    %c0_13 = arith.constant 0 : index
    %17 = vector.load %arg6[%c0_12, %c0_13] : memref<256x128xbf16, #tpu.memory_space<vmem>>, vector<256x128xbf16>
    %cst_14 = arith.constant dense<0.000000e+00> : vector<16x128xf32>
    %18 = tpu.matmul %16, %17, %cst_14 {dimension_numbers = #tpu.dot_dimension_numbers<[1], [0], [0], [1], [0, 0, 1, 1], [], []>} : vector<16x256xbf16>, vector<256x128xbf16>, vector<16x128xf32> -> vector<16x128xf32>
    %c0_15 = arith.constant 0 : index
    %c0_16 = arith.constant 0 : index
    %19 = vector.load %arg7[%c0_15, %c0_16] : memref<1x128xf32, #tpu.memory_space<vmem>>, vector<1x128xf32>
    %20 = vector.broadcast %19 : vector<1x128xf32> to vector<16x128xf32>
    %21 = arith.addf %18, %20 : vector<16x128xf32>
    %cst_17 = arith.constant 0.000000e+00 : f32
    %22 = vector.broadcast %cst_17 : f32 to vector<16x128xf32>
    %23 = arith.maximumf %21, %22 : vector<16x128xf32>
    %24 = arith.truncf %23 : vector<16x128xf32> to vector<16x128xbf16>
    %c0_18 = arith.constant 0 : index
    %c0_19 = arith.constant 0 : index
    %25 = vector.load %arg8[%c0_18, %c0_19] : memref<128x128xbf16, #tpu.memory_space<vmem>>, vector<128x128xbf16>
    %cst_20 = arith.constant dense<0.000000e+00> : vector<16x128xf32>
    %26 = tpu.matmul %24, %25, %cst_20 {dimension_numbers = #tpu.dot_dimension_numbers<[1], [0], [0], [1], [0, 0, 1, 1], [], []>} : vector<16x128xbf16>, vector<128x128xbf16>, vector<16x128xf32> -> vector<16x128xf32>
    %c0_21 = arith.constant 0 : index
    %c0_22 = arith.constant 0 : index
    %27 = vector.load %arg9[%c0_21, %c0_22] : memref<1x128xf32, #tpu.memory_space<vmem>>, vector<1x128xf32>
    %28 = vector.broadcast %27 : vector<1x128xf32> to vector<16x128xf32>
    %29 = arith.addf %26, %28 : vector<16x128xf32>
    %30 = arith.truncf %29 : vector<16x128xf32> to vector<16x128xbf16>
    %c0_23 = arith.constant 0 : index
    %c0_24 = arith.constant 0 : index
    %31 = vector.load %arg10[%c0_23, %c0_24] : memref<16x128xbf16, #tpu.memory_space<vmem>>, vector<16x128xbf16>
    tpu.vector_store %arg10[%c0_23, %c0_24], %30 {strides = array<i32>} : memref<16x128xbf16, #tpu.memory_space<vmem>>, vector<16x128xbf16>,
    return
  }
  func.func @transform_0(%arg0: i32) -> (i32, i32) {
    %c0_i32 = arith.constant 0 : i32
    %c0_i32_0 = arith.constant 0 : i32
    return %arg0, %c0_i32 : i32, i32
  }
  func.func @transform_1(%arg0: i32) -> (i32, i32) {
    %c0_i32 = arith.constant 0 : i32
    %c0_i32_0 = arith.constant 0 : i32
    %c0_i32_1 = arith.constant 0 : i32
    return %c0_i32, %c0_i32_0 : i32, i32
  }
  func.func @transform_2(%arg0: i32) -> (i32, i32) {
    %c0_i32 = arith.constant 0 : i32
    %c0_i32_0 = arith.constant 0 : i32
    %c0_i32_1 = arith.constant 0 : i32
    return %c0_i32, %c0_i32_0 : i32, i32
  }
  func.func @transform_3(%arg0: i32) -> (i32, i32) {
    %c0_i32 = arith.constant 0 : i32
    %c0_i32_0 = arith.constant 0 : i32
    %c0_i32_1 = arith.constant 0 : i32
    return %c0_i32, %c0_i32_0 : i32, i32
  }
  func.func @transform_4(%arg0: i32) -> (i32, i32) {
    %c0_i32 = arith.constant 0 : i32
    %c0_i32_0 = arith.constant 0 : i32
    %c0_i32_1 = arith.constant 0 : i32
    return %c0_i32, %c0_i32_0 : i32, i32
  }
  func.func @transform_5(%arg0: i32) -> (i32, i32) {
    %c0_i32 = arith.constant 0 : i32
    %c0_i32_0 = arith.constant 0 : i32
    %c0_i32_1 = arith.constant 0 : i32
    return %c0_i32, %c0_i32_0 : i32, i32
  }
  func.func @transform_6(%arg0: i32) -> (i32, i32) {
    %c0_i32 = arith.constant 0 : i32
    %c0_i32_0 = arith.constant 0 : i32
    %c0_i32_1 = arith.constant 0 : i32
    return %c0_i32, %c0_i32_0 : i32, i32
  }
  func.func @transform_7(%arg0: i32) -> (i32, i32) {
    %c0_i32 = arith.constant 0 : i32
    %c0_i32_0 = arith.constant 0 : i32
    %c0_i32_1 = arith.constant 0 : i32
    return %c0_i32, %c0_i32_0 : i32, i32
  }
  func.func @transform_8(%arg0: i32) -> (i32, i32) {
    %c0_i32 = arith.constant 0 : i32
    %c0_i32_0 = arith.constant 0 : i32
    %c0_i32_1 = arith.constant 0 : i32
    return %c0_i32, %c0_i32_0 : i32, i32
  }
  func.func @transform_9(%arg0: i32) -> (i32, i32) {
    %c0_i32 = arith.constant 0 : i32
    %c0_i32_0 = arith.constant 0 : i32
    return %arg0, %c0_i32 : i32, i32
  }
}

</mosaic_0001>

<bundles_post_ra>
// kernel: dqn_forward.1
= control target key start
LH: loop header
LB: loop body
LE: loop exit
PB: predicated region body
PF: predicated region fallthrough
CT: control target
= control target key end

     0   :  { %14 = vsyncpa [#allocation3], 0  ;;  %s983_s0 = inlined_call_operand.vmem [shape: bf16[16,6], index: 0, kind: input, shape index: {}]   ;;  %s984_s1 = inlined_call_operand.vmem [shape: bf16[6,128], index: 1, kind: input, shape index: {}]   ;;  %s985_s2 = inlined_call_operand.vmem [shape: f32[1,128], index: 2, kind: input, shape index: {}]   ;;  %s986_s3 = inlined_call_operand.hbm [shape: bf16[128,256], index: 3, kind: input, shape index: {}]   ;;  %s987_s4 = inlined_call_operand.vmem [shape: f32[1,256], index: 4, kind: input, shape index: {}]   ;;  %s988_s5 = inlined_call_operand.hbm [shape: bf16[256,128], index: 5, kind: input, shape index: {}]   ;;  %s989_s6 = inlined_call_operand.vmem [shape: f32[1,128], index: 6, kind: input, shape index: {}]   ;;  %s990_s7 = inlined_call_operand.hbm [shape: bf16[128,128], index: 7, kind: input, shape index: {}]   ;;  %s991_s8 = inlined_call_operand.vmem [shape: f32[1,128], index: 8, kind: input, shape index: {}]   ;;  %s992_s9 = inlined_call_operand.vmem [shape: bf16[16,128], index: 9, kind: output, shape index: {}]  }
   0x1   :  { %15 = vsyncpa [#allocation5], 0  ;;  %s847_s30 = smov [#allocation4]   ;;  %s777_s13 = scalar_lea.hbm %s988_s5, 2048 }
   0x2   :  { %s41_s10 = sshll.u32 %s847_s30, 4  ;;  %p778_p0 = scmp.ne.s32.totalorder %s988_s5, %s777_s13  ;;  %s42_s10 = int_to_ptr.vmem [resolvable:$true] %s41_s10 }
   0x3   :  { %p781_p1 = scmp.lt.u32.totalorder %s777_s13, %s988_s5 }
   0x5   :  { %p783_p2 = pnand %p781_p1, %p778_p0 }
   0x7   :  { %786 = shalt.err (!%p783_p2)
}
   0x8   :  { %s787_s18 = scalar_lea.vmem %s42_s10, 2048  ;;  %p792_p4 = scmp.lt.s32.totalorder %s42_s10, %s42_s10 }
   0x9   :  { %p788_p3 = scmp.ne.s32.totalorder %s42_s10, %s787_s18  ;;  %p793_p5 = scmp.lt.s32.totalorder %s787_s18, %s787_s18 }
   0xb   :  { %p794_p6 = por %p793_p5, %p792_p4 }
   0xd   :  { %p795_p7 = pnand %p794_p6, %p788_p3 }
   0xf   :  { %798 = shalt.err (!%p795_p7)
}
  0x10   :  { %s848_s19 = smov 64   ;;  %s849_s20 = smov 4  }
  0x11   :  { %47 = dma.hbm_to_vmem [thread:$0]  %s988_s5, 2048, %s42_s10, [#allocation5], %s848_s19, %s848_s19, %s849_s20  }
  0x12   :  { %s850_s23 = smov [#allocation2]   ;;  %s799_s27 = scalar_lea.hbm %s986_s3, 2048 }
  0x13   :  { %s27_s24 = sshll.u32 %s850_s23, 4  ;;  %p800_p8 = scmp.ne.s32.totalorder %s986_s3, %s799_s27  ;;  %s28_s24 = int_to_ptr.vmem [resolvable:$true] %s27_s24 }
  0x14   :  { %p803_p9 = scmp.lt.u32.totalorder %s799_s27, %s986_s3 }
  0x16   :  { %p805_p10 = pnand %p803_p9, %p800_p8 }
  0x18   :  { %808 = shalt.err (!%p805_p10)
}
  0x19   :  { %s809_s12 = scalar_lea.vmem %s28_s24, 2048  ;;  %p814_p12 = scmp.lt.s32.totalorder %s28_s24, %s28_s24 }
  0x1a   :  { %p810_p11 = scmp.ne.s32.totalorder %s28_s24, %s809_s12  ;;  %p815_p13 = scmp.lt.s32.totalorder %s809_s12, %s809_s12 }
  0x1c   :  { %p816_p0 = por %p815_p13, %p814_p12 }
  0x1e   :  { %p817_p1 = pnand %p816_p0, %p810_p11 }
  0x20   :  { %820 = shalt.err (!%p817_p1)
}
  0x21   :  { %s851_s5 = smov 128   ;;  %s852_s10 = smov 8  }
  0x22   :  { %33 = dma.hbm_to_vmem [thread:$0]  %s986_s3, 2048, %s28_s24, [#allocation3], %s851_s5, %s851_s5, %s852_s10  }
  0x23   :  { %s853_s15 = smov [#allocation6]   ;;  %s821_s21 = scalar_lea.hbm %s990_s7, 1024 }
  0x24   :  { %s55_s16 = sshll.u32 %s853_s15, 4  ;;  %p822_p2 = scmp.ne.s32.totalorder %s990_s7, %s821_s21  ;;  %s56_s16 = int_to_ptr.vmem [resolvable:$true] %s55_s16 }
  0x25   :  { %p825_p3 = scmp.lt.u32.totalorder %s821_s21, %s990_s7 }
  0x27   :  { %p827_p4 = pnand %p825_p3, %p822_p2 }
  0x29   :  { %830 = shalt.err (!%p827_p4)
}
  0x2a   :  { %s831_s27 = scalar_lea.vmem %s56_s16, 1024  ;;  %p836_p6 = scmp.lt.s32.totalorder %s56_s16, %s56_s16 }
  0x2b   :  { %p832_p5 = scmp.ne.s32.totalorder %s56_s16, %s831_s27  ;;  %p837_p7 = scmp.lt.s32.totalorder %s831_s27, %s831_s27 }
  0x2d   :  { %p838_p8 = por %p837_p7, %p836_p6 }
  0x2f   :  { %p839_p9 = pnand %p838_p8, %p832_p5 }
  0x31   :  { %842 = shalt.err (!%p839_p9)
}
  0x32   :  { %61 = dma.hbm_to_vmem [thread:$0]  %s990_s7, 1024, %s56_s16, [#allocation5], %s848_s19, %s848_s19, %s849_s20  }
  0x33   :  { %843 = dma.done.wait [#allocation3], 2048  }
  0x34   :  { %844 = vsyncadd [#allocation3], 4294965248 }
  0x35   :  { %845 = dma.done.wait [#allocation5], 3072  }
  0x36   :  { %846 = vsyncadd [#allocation5], 4294964224  ;;  %v854_v0 = vmov 0.0   ;;  %vm855_vm0 = vmmov 0   ;;  %vm93_vm1 = vcmask 1042432   ;;  %v728_v3 = vld [vmem:[%s983_s0] sm:$0xff]   ;;  %v159_v52 = vlaneseq }
  0x37   :  { %692 = vmatprep.subr.bf16.mxu0 %v854_v0  ;;  %694 = vmatprep.mubr.msk.bf16.mxu0 %vm855_vm0, %v854_v0  ;;  %v76_v1 = vld [vmem:[%s984_s1] sm:$0x7]  ;;  %vm89_vm2 = vcmask 48128   ;;  %v729_v4 = vld [vmem:[#allocation2 + $0x4] ss:$8 sps:$4 sm:$0xff]   ;;  %v856_v20 = vmov 0  }
  0x38   :  { %v95_v2 = vsel %vm93_vm1, %v76_v1, 0  ;;  %v731_v5 = vld [vmem:[#allocation2] ss:$8 sps:$4 sm:$0xff]   ;;  %v732_v6 = vld [vmem:[#allocation2 + $0x14] ss:$8 sps:$4 sm:$0xff]   ;;  %249 = vmatprep.subr.bf16.mxu1 %v729_v4  ;;  %281 = vmatprep.mubr.bf16.mxu1 %v856_v20  ;;  %v160_v53 = vshrl.u32 %v159_v52, 7 }
  0x39   :  { %693 = vmatpush3.bf16.msra.mxu0 %v95_v2  ;;  %250 = vmatpush1.bf16.msra.mxu1 %v731_v5  ;;  %v734_v7 = vld [vmem:[#allocation2 + $0x10] ss:$8 sps:$4 sm:$0xff]   ;;  %v735_v8 = vld [vmem:[#allocation2 + $0x24] ss:$8 sps:$4 sm:$0xff]   ;;  %v737_v9 = vld [vmem:[#allocation2 + $0x20] ss:$8 sps:$4 sm:$0xff]  }
  0x3a   :  { %251 = vmatprep.subr.bf16.mxu1 %v732_v6  ;;  %v738_v10 = vld [vmem:[#allocation2 + $0x34] ss:$8 sps:$4 sm:$0xff]   ;;  %v740_v11 = vld [vmem:[#allocation2 + $0x30] ss:$8 sps:$4 sm:$0xff]   ;;  %v741_v12 = vld [vmem:[#allocation2 + $0x44] ss:$8 sps:$4 sm:$0xff]  }
  0x3b   :  { %v743_v13 = vld [vmem:[#allocation2 + $0x40] ss:$8 sps:$4 sm:$0xff]   ;;  %v744_v14 = vld [vmem:[#allocation2 + $0x54] ss:$8 sps:$4 sm:$0xff]   ;;  %v746_v15 = vld [vmem:[#allocation2 + $0x50] ss:$8 sps:$4 sm:$0xff]  }
  0x3c   :  { %695 = vmatmul.mubr.msk.bf16.vlgmr.msra.gmra.mrb[0].mxu0 %vm89_vm2, %v728_v3  ;;  %v747_v16 = vld [vmem:[#allocation2 + $0x64] ss:$8 sps:$4 sm:$0xff]   ;;  %v749_v17 = vld [vmem:[#allocation2 + $0x60] ss:$8 sps:$4 sm:$0xff]   ;;  %v750_v18 = vld [vmem:[#allocation2 + $0x74] ss:$8 sps:$4 sm:$0xff]  }
  0x3d   :  { %252 = vmatpush1.bf16.msra.mxu1 %v734_v7  ;;  %v752_v19 = vld [vmem:[#allocation2 + $0x70] ss:$8 sps:$4 sm:$0xff]   ;;  %v753_v21 = vld [vmem:[#allocation4 + $0x40] sm:$0xff]   ;;  %v755_v23 = vld [vmem:[#allocation4 + $0x48] sm:$0xff]   ;;  %v161_v54 = vsub.s32 0, %v160_v53  ;;  %v165_v56 = vsub.s32 1, %v160_v53 }
  0x3e   :  { %253 = vmatprep.subr.bf16.mxu1 %v735_v8  ;;  %v754_v22 = vld [vmem:[#allocation4] sm:$0xff]   ;;  %661 = vmatprep.subr.bf16.mxu0 %v753_v21  ;;  %v756_v24 = vld [vmem:[#allocation4 + $0x8] sm:$0xff]   ;;  %v757_v25 = vld [vmem:[#allocation4 + $0x50] sm:$0xff]  }
  0x3f   :  { %662 = vmatpush3.bf16.msra.mxu0 %v754_v22  ;;  %v758_v26 = vld [vmem:[#allocation4 + $0x10] sm:$0xff]   ;;  %v759_v27 = vld [vmem:[#allocation4 + $0x58] sm:$0xff]   ;;  %v761_v29 = vld [vmem:[#allocation4 + $0x60] sm:$0xff]  }
  0x40   :  { %663 = vmatprep.subr.bf16.mxu0 %v755_v23  ;;  %v760_v28 = vld [vmem:[#allocation4 + $0x18] sm:$0xff]   ;;  %v762_v30 = vld [vmem:[#allocation4 + $0x20] sm:$0xff]   ;;  %v763_v31 = vld [vmem:[#allocation4 + $0x68] sm:$0xff]  }
  0x41   :  { %254 = vmatpush1.bf16.msra.mxu1 %v737_v9  ;;  %v605_v32 = vld [vmem:[%s985_s2] ss:$0 sm:$0xff]  ;;  %v764_v42 = vld [vmem:[#allocation4 + $0x28] sm:$0xff]   ;;  %v765_v43 = vld [vmem:[#allocation4 + $0x70] sm:$0xff]  }
  0x42   :  { %255 = vmatprep.subr.bf16.mxu1 %v738_v10  ;;  %v766_v44 = vld [vmem:[#allocation4 + $0x30] sm:$0xff]   ;;  %v767_v45 = vld [vmem:[#allocation4 + $0x78] sm:$0xff]   ;;  %v769_v47 = vld [vmem:[#allocation6] sm:$0xff]  }
  0x43   :  { %664 = vmatpush3.bf16.msra.mxu0 %v756_v24  ;;  %v768_v46 = vld [vmem:[#allocation4 + $0x38] sm:$0xff]   ;;  %v770_v48 = vld [vmem:[#allocation6 + $0x8] sm:$0xff]   ;;  %v771_v49 = vld [vmem:[#allocation6 + $0x10] sm:$0xff]  }
  0x44   :  { %665 = vmatprep.subr.bf16.mxu0 %v757_v25  ;;  %v772_v50 = vld [vmem:[#allocation6 + $0x18] sm:$0xff]   ;;  %v773_v51 = vld [vmem:[#allocation6 + $0x20] sm:$0xff]   ;;  %v774_v10 = vld [vmem:[#allocation6 + $0x28] sm:$0xff]  }
  0x45   :  { %256 = vmatpush1.bf16.msra.mxu1 %v740_v11  ;;  %v157_v55 = vld [vmem:[%s987_s4] sm:$0x3]  ;;  %v775_v11 = vld [vmem:[#allocation6 + $0x30] sm:$0xff]  }
  0x46   :  { %257 = vmatprep.subr.bf16.mxu1 %v741_v12  ;;  %v162_v57 = vrot.slane %v157_v55, %v161_v54  ;;  %v166_v58 = vrot.slane %v157_v55, %v165_v56  ;;  %v776_v12 = vld [vmem:[#allocation6 + $0x38] sm:$0xff]  }
  0x47   :  { %666 = vmatpush3.bf16.msra.mxu0 %v758_v26 }
  0x48   :  { %667 = vmatprep.subr.bf16.mxu0 %v759_v27 }
  0x49   :  { %258 = vmatpush1.bf16.msra.mxu1 %v743_v13 }
  0x4a   :  { %259 = vmatprep.subr.bf16.mxu1 %v744_v14  ;;  %v624_v14 = vld [vmem:[%s989_s6] ss:$0 sm:$0xff] }
  0x4b   :  { %668 = vmatpush3.bf16.msra.mxu0 %v760_v28 }
  0x4c   :  { %669 = vmatprep.subr.bf16.mxu0 %v761_v29 }
  0x4d   :  { %260 = vmatpush1.bf16.msra.mxu1 %v746_v15 }
  0x4e   :  { %261 = vmatprep.subr.bf16.mxu1 %v747_v16 }
  0x4f   :  { %670 = vmatpush3.bf16.msra.mxu0 %v762_v30 }
  0x50   :  { %671 = vmatprep.subr.bf16.mxu0 %v763_v31 }
  0x51   :  { %262 = vmatpush1.bf16.msra.mxu1 %v749_v17 }
  0x52   :  { %263 = vmatprep.subr.bf16.mxu1 %v750_v18 }
  0x53   :  { %672 = vmatpush3.bf16.msra.mxu0 %v764_v42 }
  0x54   :  { %673 = vmatprep.subr.bf16.mxu0 %v765_v43 }
  0x55   :  { %264 = vmatpush1.bf16.msra.mxu1 %v752_v19 }
  0x56   :  { %698 = vmatprep.subr.bf16.mxu1 %v854_v0 }
  0x57   :  { %674 = vmatpush3.bf16.msra.mxu0 %v766_v44 }
  0x58   :  { %675 = vmatprep.subr.bf16.mxu0 %v767_v45 }
  0x5b   :  { %676 = vmatpush3.bf16.msra.mxu0 %v768_v46 }
 0x10f   :  { %v131_v33 = vpop.f32.mrb[0].mxu0 }
 0x110   :  { %v132_v34 = vadd.f32 %v605_v32, %v131_v33  ;;  %v696_v35 = vpop.f32.mrb[1].mxu0 }
 0x111   :  { %v134_v36 = vpop.f32.mrb[2].mxu0 }
 0x112   :  { %v135_v37 = vadd.f32 %v605_v32, %v134_v36  ;;  %v697_v38 = vpop.f32.mrb[3].mxu0  ;;  %v138_v39 = vmax.f32 %v132_v34, 0.0 }
 0x114   :  { %v139_v40 = vmax.f32 %v135_v37, 0.0 }
 0x116   :  { %v140_v41 = vpack.c.bf16 %v139_v40, %v138_v39 }
 0x118   :  { %282 = vmatmul.mubr.bf16.vlgmr.msra.gmra.mrb[0].mxu1 %v140_v41 }
 0x119   :  { %714 = vmatprep.mubr.msk.bf16.mxu1 %vm855_vm0, %v854_v0  ;;  %699 = vmatpush3.bf16.msra.mxu1 %v769_v47 }
 0x11a   :  { %700 = vmatprep.subr.bf16.mxu1 %v854_v0 }
 0x11d   :  { %701 = vmatpush3.bf16.msra.mxu1 %v770_v48 }
 0x11e   :  { %702 = vmatprep.subr.bf16.mxu1 %v854_v0 }
 0x121   :  { %703 = vmatpush3.bf16.msra.mxu1 %v771_v49 }
 0x122   :  { %704 = vmatprep.subr.bf16.mxu1 %v854_v0 }
 0x125   :  { %705 = vmatpush3.bf16.msra.mxu1 %v772_v50 }
 0x126   :  { %706 = vmatprep.subr.bf16.mxu1 %v854_v0 }
 0x129   :  { %707 = vmatpush3.bf16.msra.mxu1 %v773_v51 }
 0x12a   :  { %708 = vmatprep.subr.bf16.mxu1 %v854_v0 }
 0x12d   :  { %709 = vmatpush3.bf16.msra.mxu1 %v774_v10 }
 0x12e   :  { %710 = vmatprep.subr.bf16.mxu1 %v854_v0 }
 0x131   :  { %711 = vmatpush3.bf16.msra.mxu1 %v775_v11 }
 0x132   :  { %712 = vmatprep.subr.bf16.mxu1 %v854_v0  ;;  %v641_v0 = vld [vmem:[%s991_s8] ss:$0 sm:$0xff] }
 0x135   :  { %713 = vmatpush3.bf16.msra.mxu1 %v776_v12 }
 0x1eb   :  { %v283_v59 = vpop.f32.mrb[0].mxu1 }
 0x1ec   :  { %v284_v60 = vadd.f32 %v283_v59, %v162_v57  ;;  %v285_v61 = vpop.f32.mrb[1].mxu1 }
 0x1ed   :  { %v286_v62 = vadd.f32 %v285_v61, %v166_v58  ;;  %v287_v63 = vpop.f32.mrb[2].mxu1 }
 0x1ee   :  { %v288_v1 = vadd.f32 %v287_v63, %v162_v57  ;;  %v289_v2 = vpop.f32.mrb[3].mxu1  ;;  %v292_v4 = vmax.f32 %v284_v60, 0.0 }
 0x1ef   :  { %v290_v3 = vadd.f32 %v289_v2, %v166_v58  ;;  %v293_v6 = vmax.f32 %v286_v62, 0.0 }
 0x1f0   :  { %v294_v5 = vmax.f32 %v288_v1, 0.0 }
 0x1f1   :  { %v295_v7 = vmax.f32 %v290_v3, 0.0 }
 0x1f2   :  { %v296_v8 = vpack.c.bf16 %v294_v5, %v292_v4 }
 0x1f3   :  { %v297_v9 = vpack.c.bf16 %v295_v7, %v293_v6 }
 0x1f5   :  { %465 = vmatprep.mubr.bf16.mxu0 %v297_v9 }
 0x1f6   :  { %466 = vmatmul.mubr.bf16.vlgmr.msra.gmra.mrb[4].mxu0 %v296_v8 }
 0x2c9   :  { %v677_v13 = vpop.f32.mrb[4].mxu0 }
 0x2ca   :  { %v678_v15 = vpop.f32.mrb[5].mxu0 }
 0x2cb   :  { %v679_v16 = vadd.f32 %v678_v15, %v677_v13  ;;  %v680_v17 = vpop.f32.mrb[6].mxu0 }
 0x2cc   :  { %v681_v18 = vpop.f32.mrb[7].mxu0 }
 0x2cd   :  { %v468_v19 = vadd.f32 %v679_v16, %v624_v14  ;;  %v682_v20 = vadd.f32 %v681_v18, %v680_v17 }
 0x2cf   :  { %v471_v21 = vadd.f32 %v682_v20, %v624_v14  ;;  %v474_v22 = vmax.f32 %v468_v19, 0.0 }
 0x2d1   :  { %v475_v23 = vmax.f32 %v471_v21, 0.0 }
 0x2d3   :  { %v476_v24 = vpack.c.bf16 %v475_v23, %v474_v22 }
 0x2d5   :  { %715 = vmatmul.mubr.bf16.vlgmr.msra.gmra.mrb[4].mxu1 %v476_v24 }
 0x3a8   :  { %v582_v25 = vpop.f32.mrb[4].mxu1 }
 0x3a9   :  { %v716_v26 = vpop.f32.mrb[5].mxu1  ;;  %v583_v28 = vadd.f32 %v641_v0, %v582_v25 }
 0x3aa   :  { %v585_v27 = vpop.f32.mrb[6].mxu1 }
 0x3ab   :  { %v586_v29 = vadd.f32 %v641_v0, %v585_v27  ;;  %v717_v30 = vpop.f32.mrb[7].mxu1 }
 0x3ad   :  { %v657_v31 = vpack.c.bf16 %v586_v29, %v583_v28 }
 0x3af   :  { %658 = vst [vmem:[%s992_s9] sm:$0xff] %v657_v31  }
 0x3b0   :  { %603 = vsyncpa [#allocation3], 1 }
 0x3b1   :  { %604 = vsyncpa [#allocation5], 1 }

</bundles_post_ra>
